<compile_context>
chip_gen: v5e
topology: v5e:2x2
jax: 0.10.0
libtpu: 0.0.40
codegen_flags: <defaults>
</compile_context>

<pallas_src>
import functools
import math

import jax
import jax.numpy as jnp
from jax.experimental import pallas as pl
from jax.experimental.pallas import tpu as pltpu

LEAKY_SLOPE = 0.01          # nn.LeakyReLU default
SCALE_BOUND = 0.11          # GaussianConditional default scale lower bound
LIKELIHOOD_BOUND = 1e-9     # default likelihood lower bound
EB_FILTERS = (3, 3, 3, 3)   # EntropyBottleneck default filters
INIT_SCALE = 10.0           # EntropyBottleneck default init_scale


# ---------------------------------------------------------------------------
# in-kernel math helpers (only exp/log/tanh/where — guaranteed Mosaic lowering)
# ---------------------------------------------------------------------------
def _sign(x):
    return jnp.where(x > 0, 1.0, jnp.where(x < 0, -1.0, 0.0))


def _erf(x):
    # Abramowitz & Stegun 7.1.26 polynomial, |abs err| <= 1.5e-7 (fp32 level).
    a1, a2, a3, a4, a5 = 0.254829592, -0.284496736, 1.421413741, -1.453152027, 1.061405429
    p = 0.3275911
    s = _sign(x)
    ax = jnp.abs(x)
    t = 1.0 / (1.0 + p * ax)
    y = 1.0 - (((((a5 * t + a4) * t + a3) * t + a2) * t + a1) * t) * jnp.exp(-ax * ax)
    return s * y


def _std_cumulative(x):
    # GaussianConditional._standardized_cumulative: 0.5 * erfc(-x / sqrt(2))
    return 0.5 * (1.0 + _erf(x * (1.0 / math.sqrt(2.0))))


def _sigmoid(x):
    # 1 EUP op (tanh) instead of exp + reciprocal.
    return 0.5 * (1.0 + jnp.tanh(0.5 * x))


def _leaky_relu(x):
    return jnp.where(x >= 0, x, LEAKY_SLOPE * x)


# ---------------------------------------------------------------------------
# kernel
# ---------------------------------------------------------------------------
def _hyperprior_kernel(x_ref, w1_ref, b1_ref,
                       w2mu_ref, b2mu_ref, w2sg_ref, b2sg_ref,
                       eb_mat2_ref, eb_bias2_ref, eb_fac2_ref, med_ref,
                       out_ref, *, B, N, M):
    x = x_ref[...]                                           # (B, N) f32

    # ---- hyper_encoder: Linear(N, M) + LeakyReLU --------------------------
    z = jnp.dot(x, w1_ref[...], preferred_element_type=jnp.float32) + b1_ref[...]
    z = _leaky_relu(z)                                       # (B, M)

    # ---- EntropyBottleneck (factorized prior), eval-mode quantization -----
    med = med_ref[...]                                       # (1, M)
    z_hat = jnp.round(z - med) + med                         # (B, M)

    # lane-pack both CDF evaluation points: [z_hat - 0.5 | z_hat + 0.5]
    v = jnp.concatenate([z_hat - 0.5, z_hat + 0.5], axis=-1)  # (B, 2M)

    # logits_cumulative on the packed tensor.  EB params arrive pre-activated
    # (softplus / tanh already applied, input-independent) and pre-tiled to 2M,
    # so the unrolled loop is pure VPU mul/add plus one tanh per factor row.
    filters = (1,) + EB_FILTERS + (1,)
    logits = [v]
    mat_row = bias_row = fac_row = 0
    for i in range(len(EB_FILTERS) + 1):
        f_in, f_out = filters[i], filters[i + 1]
        new = []
        for j in range(f_out):
            acc = eb_bias2_ref[pl.ds(bias_row + j, 1), :]                # (1, 2M)
            for k in range(f_in):
                w = eb_mat2_ref[pl.ds(mat_row + j * f_in + k, 1), :]     # (1, 2M)
                acc = acc + w * logits[k]
            new.append(acc)
        mat_row += f_out * f_in
        bias_row += f_out
        if i < len(EB_FILTERS):
            for j in range(f_out):
                fac = eb_fac2_ref[pl.ds(fac_row + j, 1), :]              # (1, 2M)
                new[j] = new[j] + fac * jnp.tanh(new[j])
            fac_row += f_out
        logits = new
    logits = logits[0]                                       # (B, 2M): [lower | upper]

    lower = logits[:, :M]
    upper = logits[:, M:]
    sgn = -_sign(lower + upper)                              # (B, M)
    sgn2 = jnp.concatenate([sgn, sgn], axis=-1)              # (B, 2M)
    sig = _sigmoid(sgn2 * logits)                            # one tanh for both branches
    z_llh = jnp.maximum(jnp.abs(sig[:, M:] - sig[:, :M]), LIKELIHOOD_BOUND)   # (B, M)

    # ---- hyper_decoder: Linear(M, 2N) + LeakyReLU, pre-split mu / sigma ----
    mu = _leaky_relu(jnp.dot(z_hat, w2mu_ref[...],
                             preferred_element_type=jnp.float32) + b2mu_ref[...])     # (B, N)
    sigma = _leaky_relu(jnp.dot(z_hat, w2sg_ref[...],
                                preferred_element_type=jnp.float32) + b2sg_ref[...])  # (B, N)

    # ---- GaussianConditional, eval-mode quantization ----------------------
    x_hat = jnp.round(x - mu) + mu
    neg_v = -jnp.abs(x_hat - mu)                             # (B, N)
    inv_s = 1.0 / jnp.maximum(sigma, SCALE_BOUND)            # (B, N)
    # lane-pack both CDF arguments: [(0.5-|v|)/s | (-0.5-|v|)/s] -> (B, 2N)
    arg = jnp.concatenate([(neg_v + 0.5) * inv_s, (neg_v - 0.5) * inv_s], axis=-1)
    cdf = _std_cumulative(arg)                               # one erf/exp for both
    x_llh = jnp.maximum(cdf[:, :N] - cdf[:, N:], LIKELIHOOD_BOUND)   # (B, N)

    # ---- rate (matches reference: sum(-log2) / (B*N), / (B*M)) ------------
    inv_ln2 = 1.0 / math.log(2.0)
    rate_x = jnp.sum(-jnp.log(x_llh)) * (inv_ln2 / float(B * N))
    rate_z = jnp.sum(-jnp.log(z_llh)) * (inv_ln2 / float(B * M))
    out_ref[0, 0] = rate_x + rate_z                          # scalar -> SMEM


# ---------------------------------------------------------------------------
# wrapper
# ---------------------------------------------------------------------------
def small_hyperprior_forward(x_nchw, prepared):
    B, N = x_nchw.shape[0], x_nchw.shape[1]
    M = prepared["w1"].shape[1]
    x2d = x_nchw.reshape(B, -1).astype(jnp.float32)          # (B, N); H = W = 1

    args = (x2d, prepared["w1"], prepared["b1"],
            prepared["w2_mu"], prepared["b2_mu"],
            prepared["w2_sg"], prepared["b2_sg"],
            prepared["eb_mat2"], prepared["eb_bias2"], prepared["eb_fac2"],
            prepared["medians"])

    kernel = functools.partial(_hyperprior_kernel, B=B, N=N, M=M)
    # NOTE: at large B, add a "parallel" batch grid (weights with constant
    # index_map) so v7x's second TensorCore is used; at B=8 a single
    # invocation is optimal.
    out = pl.pallas_call(
        kernel,
        out_shape=jax.ShapeDtypeStruct((1, 1), jnp.float32),
        in_specs=[pl.BlockSpec(memory_space=pltpu.MemorySpace.VMEM)] * len(args),
        out_specs=pl.BlockSpec(memory_space=pltpu.MemorySpace.SMEM),
    )(*args)
    return out[0, 0]


# ---------------------------------------------------------------------------
# one-time, input-independent parameter preprocessing (hoisted out of kernel)
# ---------------------------------------------------------------------------
def prepare_params(raw):
    """Derive kernel-ready params from the raw (PyTorch-layout) parameters.

    - softplus(_matrix{i}) / tanh(_factor{i}) are applied here once (they are
      functions of parameters only, so per-forward re-evaluation is wasted EUP
      work inside the kernel).  jax.nn.softplus is the thresholded/stable form.
    - EB rows are lane-tiled to width 2M so the kernel evaluates the packed
      [z_hat-0.5 | z_hat+0.5] tensor in a single pass.
    - hyper_decoder weights are split into mu / sigma halves so the kernel
      never slices the matmul output at a non-lane-aligned boundary.
    """
    N = raw["w1"].shape[0]
    two = lambda a: jnp.concatenate([a, a], axis=-1)
    sp_mat = jax.nn.softplus(raw["eb_mat"])
    th_fac = jnp.tanh(raw["eb_factor"])
    return dict(
        w1=raw["w1"], b1=raw["b1"],
        w2_mu=raw["w2"][:, :N], b2_mu=raw["b2"][:, :N],
        w2_sg=raw["w2"][:, N:], b2_sg=raw["b2"][:, N:],
        eb_mat2=two(sp_mat),          # (33, 2M), pre-softplus'd
        eb_bias2=two(raw["eb_bias"]), # (13, 2M)
        eb_fac2=two(th_fac),          # (12, 2M), pre-tanh'd
        medians=raw["medians"],       # (1, M)
    )


# ---------------------------------------------------------------------------
# deterministic raw parameter init (mirrors the PyTorch __init__ shapes)
# ---------------------------------------------------------------------------
def init_params(key, N, M):
    k1, k2, k3, k4, k5 = jax.random.split(key, 5)

    lim1 = 1.0 / math.sqrt(N)
    w1 = jax.random.uniform(k1, (N, M), jnp.float32, -lim1, lim1)      # Linear(N, M)
    b1 = jax.random.uniform(k2, (1, M), jnp.float32, -lim1, lim1)
    lim2 = 1.0 / math.sqrt(M)
    w2 = jax.random.uniform(k3, (M, 2 * N), jnp.float32, -lim2, lim2)  # Linear(M, 2N)
    b2 = jax.random.uniform(k4, (1, 2 * N), jnp.float32, -lim2, lim2)

    # EntropyBottleneck(M) parameters, following compressai's default init.
    filters = (1,) + EB_FILTERS + (1,)
    scale = INIT_SCALE ** (1.0 / (len(EB_FILTERS) + 1))
    mat_rows, bias_rows, fac_rows = [], [], []
    bkeys = jax.random.split(k5, len(EB_FILTERS) + 1)
    for i in range(len(EB_FILTERS) + 1):
        f_in, f_out = filters[i], filters[i + 1]
        init = math.log(math.expm1(1.0 / scale / filters[i + 1]))
        mat_rows.append(jnp.full((f_out * f_in, M), init, jnp.float32))     # _matrix{i}
        bias_rows.append(jax.random.uniform(bkeys[i], (f_out, M), jnp.float32,
                                            -0.5, 0.5))                     # _bias{i}
        if i < len(EB_FILTERS):
            fac_rows.append(jnp.zeros((f_out, M), jnp.float32))             # _factor{i}

    eb_mat = jnp.concatenate(mat_rows, axis=0)       # (33, M)
    eb_bias = jnp.concatenate(bias_rows, axis=0)     # (13, M)
    eb_factor = jnp.concatenate(fac_rows, axis=0)    # (12, M)
    # quantiles init to [-10, 0, 10] per channel -> median = 0
    medians = jnp.zeros((1, M), jnp.float32)

    return dict(w1=w1, b1=b1, w2=w2, b2=b2,
                eb_mat=eb_mat, eb_bias=eb_bias, eb_factor=eb_factor,
                medians=medians)


if __name__ == "__main__":
    B, N, M = 8, 32, 16
    key = jax.random.PRNGKey(0)
    kx, kp = jax.random.split(key)

    x = jax.random.normal(kx, (B, N, 1, 1), jnp.float32)   # NCHW, H = W = 1
    raw_params = init_params(kp, N, M)
    params = prepare_params(raw_params)                    # one-time precompute

    rate = small_hyperprior_forward(x, params)
    jax.block_until_ready(rate)
    print("KERNEL_OK")
</pallas_src>

<mosaic_0001>
module attributes {stable_mosaic.version = 11 : i64} {
  func.func @_hyperprior_kernel(%arg0: memref<8x32xf32, #tpu.memory_space<vmem>>, %arg1: memref<32x16xf32, #tpu.memory_space<vmem>>, %arg2: memref<1x16xf32, #tpu.memory_space<vmem>>, %arg3: memref<16x32xf32, #tpu.memory_space<vmem>>, %arg4: memref<1x32xf32, #tpu.memory_space<vmem>>, %arg5: memref<16x32xf32, #tpu.memory_space<vmem>>, %arg6: memref<1x32xf32, #tpu.memory_space<vmem>>, %arg7: memref<33x32xf32, #tpu.memory_space<vmem>>, %arg8: memref<13x32xf32, #tpu.memory_space<vmem>>, %arg9: memref<12x32xf32, #tpu.memory_space<vmem>>, %arg10: memref<1x16xf32, #tpu.memory_space<vmem>>, %arg11: memref<1x1xf32, #tpu.memory_space<smem>>) attributes {dimension_semantics = [], scalar_prefetch = 0 : i64, scratch_operands = 0 : i64, tpu.core_type = #tpu.core_type<tc>} {
    %c0 = arith.constant 0 : index
    %c0_0 = arith.constant 0 : index
    %0 = vector.load %arg0[%c0, %c0_0] : memref<8x32xf32, #tpu.memory_space<vmem>>, vector<8x32xf32>
    %c0_1 = arith.constant 0 : index
    %c0_2 = arith.constant 0 : index
    %1 = vector.load %arg1[%c0_1, %c0_2] : memref<32x16xf32, #tpu.memory_space<vmem>>, vector<32x16xf32>
    %cst = arith.constant dense<0.000000e+00> : vector<8x16xf32>
    %2 = tpu.matmul %0, %1, %cst {dimension_numbers = #tpu.dot_dimension_numbers<[1], [0], [0], [1], [0, 0, 1, 1], [], []>} : vector<8x32xf32>, vector<32x16xf32>, vector<8x16xf32> -> vector<8x16xf32>
    %c0_3 = arith.constant 0 : index
    %c0_4 = arith.constant 0 : index
    %3 = vector.load %arg2[%c0_3, %c0_4] : memref<1x16xf32, #tpu.memory_space<vmem>>, vector<1x16xf32>
    %4 = vector.broadcast %3 : vector<1x16xf32> to vector<8x16xf32>
    %5 = arith.addf %2, %4 : vector<8x16xf32>
    %cst_5 = arith.constant 0.000000e+00 : f32
    %6 = vector.broadcast %cst_5 : f32 to vector<8x16xf32>
    %7 = arith.cmpf oge, %5, %6 : vector<8x16xf32>
    %cst_6 = arith.constant 0.00999999977 : f32
    %8 = vector.broadcast %cst_6 : f32 to vector<8x16xf32>
    %9 = arith.mulf %8, %5 : vector<8x16xf32>
    %10 = arith.select %7, %5, %9 : vector<8x16xi1>, vector<8x16xf32>
    %c0_7 = arith.constant 0 : index
    %c0_8 = arith.constant 0 : index
    %11 = vector.load %arg10[%c0_7, %c0_8] : memref<1x16xf32, #tpu.memory_space<vmem>>, vector<1x16xf32>
    %12 = vector.broadcast %11 : vector<1x16xf32> to vector<8x16xf32>
    %13 = arith.subf %10, %12 : vector<8x16xf32>
    %14 = math.roundeven %13 : vector<8x16xf32>
    %15 = vector.broadcast %11 : vector<1x16xf32> to vector<8x16xf32>
    %16 = arith.addf %14, %15 : vector<8x16xf32>
    %cst_9 = arith.constant 5.000000e-01 : f32
    %17 = vector.broadcast %cst_9 : f32 to vector<8x16xf32>
    %18 = arith.subf %16, %17 : vector<8x16xf32>
    %cst_10 = arith.constant 5.000000e-01 : f32
    %19 = vector.broadcast %cst_10 : f32 to vector<8x16xf32>
    %20 = arith.addf %16, %19 : vector<8x16xf32>
    %21 = tpu.concatenate %18, %20 in 1 : vector<8x16xf32>, vector<8x16xf32> -> vector<8x32xf32>
    %c0_11 = arith.constant 0 : index
    %c0_12 = arith.constant 0 : index
    %22 = vector.load %arg8[%c0_11, %c0_12] : memref<13x32xf32, #tpu.memory_space<vmem>>, vector<1x32xf32>
    %c0_13 = arith.constant 0 : index
    %c0_14 = arith.constant 0 : index
    %23 = vector.load %arg7[%c0_13, %c0_14] : memref<33x32xf32, #tpu.memory_space<vmem>>, vector<1x32xf32>
    %24 = vector.broadcast %23 : vector<1x32xf32> to vector<8x32xf32>
    %25 = arith.mulf %24, %21 : vector<8x32xf32>
    %26 = vector.broadcast %22 : vector<1x32xf32> to vector<8x32xf32>
    %27 = arith.addf %26, %25 : vector<8x32xf32>
    %c1 = arith.constant 1 : index
    %c0_15 = arith.constant 0 : index
    %28 = vector.load %arg8[%c1, %c0_15] : memref<13x32xf32, #tpu.memory_space<vmem>>, vector<1x32xf32>
    %c1_16 = arith.constant 1 : index
    %c0_17 = arith.constant 0 : index
    %29 = vector.load %arg7[%c1_16, %c0_17] : memref<33x32xf32, #tpu.memory_space<vmem>>, vector<1x32xf32>
    %30 = vector.broadcast %29 : vector<1x32xf32> to vector<8x32xf32>
    %31 = arith.mulf %30, %21 : vector<8x32xf32>
    %32 = vector.broadcast %28 : vector<1x32xf32> to vector<8x32xf32>
    %33 = arith.addf %32, %31 : vector<8x32xf32>
    %c2 = arith.constant 2 : index
    %c0_18 = arith.constant 0 : index
    %34 = vector.load %arg8[%c2, %c0_18] : memref<13x32xf32, #tpu.memory_space<vmem>>, vector<1x32xf32>
    %c2_19 = arith.constant 2 : index
    %c0_20 = arith.constant 0 : index
    %35 = vector.load %arg7[%c2_19, %c0_20] : memref<33x32xf32, #tpu.memory_space<vmem>>, vector<1x32xf32>
    %36 = vector.broadcast %35 : vector<1x32xf32> to vector<8x32xf32>
    %37 = arith.mulf %36, %21 : vector<8x32xf32>
    %38 = vector.broadcast %34 : vector<1x32xf32> to vector<8x32xf32>
    %39 = arith.addf %38, %37 : vector<8x32xf32>
    %c0_21 = arith.constant 0 : index
    %c0_22 = arith.constant 0 : index
    %40 = vector.load %arg9[%c0_21, %c0_22] : memref<12x32xf32, #tpu.memory_space<vmem>>, vector<1x32xf32>
    %41 = math.tanh %27 : vector<8x32xf32>
    %42 = vector.broadcast %40 : vector<1x32xf32> to vector<8x32xf32>
    %43 = arith.mulf %42, %41 : vector<8x32xf32>
    %44 = arith.addf %27, %43 : vector<8x32xf32>
    %c1_23 = arith.constant 1 : index
    %c0_24 = arith.constant 0 : index
    %45 = vector.load %arg9[%c1_23, %c0_24] : memref<12x32xf32, #tpu.memory_space<vmem>>, vector<1x32xf32>
    %46 = math.tanh %33 : vector<8x32xf32>
    %47 = vector.broadcast %45 : vector<1x32xf32> to vector<8x32xf32>
    %48 = arith.mulf %47, %46 : vector<8x32xf32>
    %49 = arith.addf %33, %48 : vector<8x32xf32>
    %c2_25 = arith.constant 2 : index
    %c0_26 = arith.constant 0 : index
    %50 = vector.load %arg9[%c2_25, %c0_26] : memref<12x32xf32, #tpu.memory_space<vmem>>, vector<1x32xf32>
    %51 = math.tanh %39 : vector<8x32xf32>
    %52 = vector.broadcast %50 : vector<1x32xf32> to vector<8x32xf32>
    %53 = arith.mulf %52, %51 : vector<8x32xf32>
    %54 = arith.addf %39, %53 : vector<8x32xf32>
    %c3 = arith.constant 3 : index
    %c0_27 = arith.constant 0 : index
    %55 = vector.load %arg8[%c3, %c0_27] : memref<13x32xf32, #tpu.memory_space<vmem>>, vector<1x32xf32>
    %c3_28 = arith.constant 3 : index
    %c0_29 = arith.constant 0 : index
    %56 = vector.load %arg7[%c3_28, %c0_29] : memref<33x32xf32, #tpu.memory_space<vmem>>, vector<1x32xf32>
    %57 = vector.broadcast %56 : vector<1x32xf32> to vector<8x32xf32>
    %58 = arith.mulf %57, %44 : vector<8x32xf32>
    %59 = vector.broadcast %55 : vector<1x32xf32> to vector<8x32xf32>
    %60 = arith.addf %59, %58 : vector<8x32xf32>
    %c4 = arith.constant 4 : index
    %c0_30 = arith.constant 0 : index
    %61 = vector.load %arg7[%c4, %c0_30] : memref<33x32xf32, #tpu.memory_space<vmem>>, vector<1x32xf32>
    %62 = vector.broadcast %61 : vector<1x32xf32> to vector<8x32xf32>
    %63 = arith.mulf %62, %49 : vector<8x32xf32>
    %64 = arith.addf %60, %63 : vector<8x32xf32>
    %c5 = arith.constant 5 : index
    %c0_31 = arith.constant 0 : index
    %65 = vector.load %arg7[%c5, %c0_31] : memref<33x32xf32, #tpu.memory_space<vmem>>, vector<1x32xf32>
    %66 = vector.broadcast %65 : vector<1x32xf32> to vector<8x32xf32>
    %67 = arith.mulf %66, %54 : vector<8x32xf32>
    %68 = arith.addf %64, %67 : vector<8x32xf32>
    %c4_32 = arith.constant 4 : index
    %c0_33 = arith.constant 0 : index
    %69 = vector.load %arg8[%c4_32, %c0_33] : memref<13x32xf32, #tpu.memory_space<vmem>>, vector<1x32xf32>
    %c6 = arith.constant 6 : index
    %c0_34 = arith.constant 0 : index
    %70 = vector.load %arg7[%c6, %c0_34] : memref<33x32xf32, #tpu.memory_space<vmem>>, vector<1x32xf32>
    %71 = vector.broadcast %70 : vector<1x32xf32> to vector<8x32xf32>
    %72 = arith.mulf %71, %44 : vector<8x32xf32>
    %73 = vector.broadcast %69 : vector<1x32xf32> to vector<8x32xf32>
    %74 = arith.addf %73, %72 : vector<8x32xf32>
    %c7 = arith.constant 7 : index
    %c0_35 = arith.constant 0 : index
    %75 = vector.load %arg7[%c7, %c0_35] : memref<33x32xf32, #tpu.memory_space<vmem>>, vector<1x32xf32>
    %76 = vector.broadcast %75 : vector<1x32xf32> to vector<8x32xf32>
    %77 = arith.mulf %76, %49 : vector<8x32xf32>
    %78 = arith.addf %74, %77 : vector<8x32xf32>
    %c8 = arith.constant 8 : index
    %c0_36 = arith.constant 0 : index
    %79 = vector.load %arg7[%c8, %c0_36] : memref<33x32xf32, #tpu.memory_space<vmem>>, vector<1x32xf32>
    %80 = vector.broadcast %79 : vector<1x32xf32> to vector<8x32xf32>
    %81 = arith.mulf %80, %54 : vector<8x32xf32>
    %82 = arith.addf %78, %81 : vector<8x32xf32>
    %c5_37 = arith.constant 5 : index
    %c0_38 = arith.constant 0 : index
    %83 = vector.load %arg8[%c5_37, %c0_38] : memref<13x32xf32, #tpu.memory_space<vmem>>, vector<1x32xf32>
    %c9 = arith.constant 9 : index
    %c0_39 = arith.constant 0 : index
    %84 = vector.load %arg7[%c9, %c0_39] : memref<33x32xf32, #tpu.memory_space<vmem>>, vector<1x32xf32>
    %85 = vector.broadcast %84 : vector<1x32xf32> to vector<8x32xf32>
    %86 = arith.mulf %85, %44 : vector<8x32xf32>
    %87 = vector.broadcast %83 : vector<1x32xf32> to vector<8x32xf32>
    %88 = arith.addf %87, %86 : vector<8x32xf32>
    %c10 = arith.constant 10 : index
    %c0_40 = arith.constant 0 : index
    %89 = vector.load %arg7[%c10, %c0_40] : memref<33x32xf32, #tpu.memory_space<vmem>>, vector<1x32xf32>
    %90 = vector.broadcast %89 : vector<1x32xf32> to vector<8x32xf32>
    %91 = arith.mulf %90, %49 : vector<8x32xf32>
    %92 = arith.addf %88, %91 : vector<8x32xf32>
    %c11 = arith.constant 11 : index
    %c0_41 = arith.constant 0 : index
    %93 = vector.load %arg7[%c11, %c0_41] : memref<33x32xf32, #tpu.memory_space<vmem>>, vector<1x32xf32>
    %94 = vector.broadcast %93 : vector<1x32xf32> to vector<8x32xf32>
    %95 = arith.mulf %94, %54 : vector<8x32xf32>
    %96 = arith.addf %92, %95 : vector<8x32xf32>
    %c3_42 = arith.constant 3 : index
    %c0_43 = arith.constant 0 : index
    %97 = vector.load %arg9[%c3_42, %c0_43] : memref<12x32xf32, #tpu.memory_space<vmem>>, vector<1x32xf32>
    %98 = math.tanh %68 : vector<8x32xf32>
    %99 = vector.broadcast %97 : vector<1x32xf32> to vector<8x32xf32>
    %100 = arith.mulf %99, %98 : vector<8x32xf32>
    %101 = arith.addf %68, %100 : vector<8x32xf32>
    %c4_44 = arith.constant 4 : index
    %c0_45 = arith.constant 0 : index
    %102 = vector.load %arg9[%c4_44, %c0_45] : memref<12x32xf32, #tpu.memory_space<vmem>>, vector<1x32xf32>
    %103 = math.tanh %82 : vector<8x32xf32>
    %104 = vector.broadcast %102 : vector<1x32xf32> to vector<8x32xf32>
    %105 = arith.mulf %104, %103 : vector<8x32xf32>
    %106 = arith.addf %82, %105 : vector<8x32xf32>
    %c5_46 = arith.constant 5 : index
    %c0_47 = arith.constant 0 : index
    %107 = vector.load %arg9[%c5_46, %c0_47] : memref<12x32xf32, #tpu.memory_space<vmem>>, vector<1x32xf32>
    %108 = math.tanh %96 : vector<8x32xf32>
    %109 = vector.broadcast %107 : vector<1x32xf32> to vector<8x32xf32>
    %110 = arith.mulf %109, %108 : vector<8x32xf32>
    %111 = arith.addf %96, %110 : vector<8x32xf32>
    %c6_48 = arith.constant 6 : index
    %c0_49 = arith.constant 0 : index
    %112 = vector.load %arg8[%c6_48, %c0_49] : memref<13x32xf32, #tpu.memory_space<vmem>>, vector<1x32xf32>
    %c12 = arith.constant 12 : index
    %c0_50 = arith.constant 0 : index
    %113 = vector.load %arg7[%c12, %c0_50] : memref<33x32xf32, #tpu.memory_space<vmem>>, vector<1x32xf32>
    %114 = vector.broadcast %113 : vector<1x32xf32> to vector<8x32xf32>
    %115 = arith.mulf %114, %101 : vector<8x32xf32>
    %116 = vector.broadcast %112 : vector<1x32xf32> to vector<8x32xf32>
    %117 = arith.addf %116, %115 : vector<8x32xf32>
    %c13 = arith.constant 13 : index
    %c0_51 = arith.constant 0 : index
    %118 = vector.load %arg7[%c13, %c0_51] : memref<33x32xf32, #tpu.memory_space<vmem>>, vector<1x32xf32>
    %119 = vector.broadcast %118 : vector<1x32xf32> to vector<8x32xf32>
    %120 = arith.mulf %119, %106 : vector<8x32xf32>
    %121 = arith.addf %117, %120 : vector<8x32xf32>
    %c14 = arith.constant 14 : index
    %c0_52 = arith.constant 0 : index
    %122 = vector.load %arg7[%c14, %c0_52] : memref<33x32xf32, #tpu.memory_space<vmem>>, vector<1x32xf32>
    %123 = vector.broadcast %122 : vector<1x32xf32> to vector<8x32xf32>
    %124 = arith.mulf %123, %111 : vector<8x32xf32>
    %125 = arith.addf %121, %124 : vector<8x32xf32>
    %c7_53 = arith.constant 7 : index
    %c0_54 = arith.constant 0 : index
    %126 = vector.load %arg8[%c7_53, %c0_54] : memref<13x32xf32, #tpu.memory_space<vmem>>, vector<1x32xf32>
    %c15 = arith.constant 15 : index
    %c0_55 = arith.constant 0 : index
    %127 = vector.load %arg7[%c15, %c0_55] : memref<33x32xf32, #tpu.memory_space<vmem>>, vector<1x32xf32>
    %128 = vector.broadcast %127 : vector<1x32xf32> to vector<8x32xf32>
    %129 = arith.mulf %128, %101 : vector<8x32xf32>
    %130 = vector.broadcast %126 : vector<1x32xf32> to vector<8x32xf32>
    %131 = arith.addf %130, %129 : vector<8x32xf32>
    %c16 = arith.constant 16 : index
    %c0_56 = arith.constant 0 : index
    %132 = vector.load %arg7[%c16, %c0_56] : memref<33x32xf32, #tpu.memory_space<vmem>>, vector<1x32xf32>
    %133 = vector.broadcast %132 : vector<1x32xf32> to vector<8x32xf32>
    %134 = arith.mulf %133, %106 : vector<8x32xf32>
    %135 = arith.addf %131, %134 : vector<8x32xf32>
    %c17 = arith.constant 17 : index
    %c0_57 = arith.constant 0 : index
    %136 = vector.load %arg7[%c17, %c0_57] : memref<33x32xf32, #tpu.memory_space<vmem>>, vector<1x32xf32>
    %137 = vector.broadcast %136 : vector<1x32xf32> to vector<8x32xf32>
    %138 = arith.mulf %137, %111 : vector<8x32xf32>
    %139 = arith.addf %135, %138 : vector<8x32xf32>
    %c8_58 = arith.constant 8 : index
    %c0_59 = arith.constant 0 : index
    %140 = vector.load %arg8[%c8_58, %c0_59] : memref<13x32xf32, #tpu.memory_space<vmem>>, vector<1x32xf32>
    %c18 = arith.constant 18 : index
    %c0_60 = arith.constant 0 : index
    %141 = vector.load %arg7[%c18, %c0_60] : memref<33x32xf32, #tpu.memory_space<vmem>>, vector<1x32xf32>
    %142 = vector.broadcast %141 : vector<1x32xf32> to vector<8x32xf32>
    %143 = arith.mulf %142, %101 : vector<8x32xf32>
    %144 = vector.broadcast %140 : vector<1x32xf32> to vector<8x32xf32>
    %145 = arith.addf %144, %143 : vector<8x32xf32>
    %c19 = arith.constant 19 : index
    %c0_61 = arith.constant 0 : index
    %146 = vector.load %arg7[%c19, %c0_61] : memref<33x32xf32, #tpu.memory_space<vmem>>, vector<1x32xf32>
    %147 = vector.broadcast %146 : vector<1x32xf32> to vector<8x32xf32>
    %148 = arith.mulf %147, %106 : vector<8x32xf32>
    %149 = arith.addf %145, %148 : vector<8x32xf32>
    %c20 = arith.constant 20 : index
    %c0_62 = arith.constant 0 : index
    %150 = vector.load %arg7[%c20, %c0_62] : memref<33x32xf32, #tpu.memory_space<vmem>>, vector<1x32xf32>
    %151 = vector.broadcast %150 : vector<1x32xf32> to vector<8x32xf32>
    %152 = arith.mulf %151, %111 : vector<8x32xf32>
    %153 = arith.addf %149, %152 : vector<8x32xf32>
    %c6_63 = arith.constant 6 : index
    %c0_64 = arith.constant 0 : index
    %154 = vector.load %arg9[%c6_63, %c0_64] : memref<12x32xf32, #tpu.memory_space<vmem>>, vector<1x32xf32>
    %155 = math.tanh %125 : vector<8x32xf32>
    %156 = vector.broadcast %154 : vector<1x32xf32> to vector<8x32xf32>
    %157 = arith.mulf %156, %155 : vector<8x32xf32>
    %158 = arith.addf %125, %157 : vector<8x32xf32>
    %c7_65 = arith.constant 7 : index
    %c0_66 = arith.constant 0 : index
    %159 = vector.load %arg9[%c7_65, %c0_66] : memref<12x32xf32, #tpu.memory_space<vmem>>, vector<1x32xf32>
    %160 = math.tanh %139 : vector<8x32xf32>
    %161 = vector.broadcast %159 : vector<1x32xf32> to vector<8x32xf32>
    %162 = arith.mulf %161, %160 : vector<8x32xf32>
    %163 = arith.addf %139, %162 : vector<8x32xf32>
    %c8_67 = arith.constant 8 : index
    %c0_68 = arith.constant 0 : index
    %164 = vector.load %arg9[%c8_67, %c0_68] : memref<12x32xf32, #tpu.memory_space<vmem>>, vector<1x32xf32>
    %165 = math.tanh %153 : vector<8x32xf32>
    %166 = vector.broadcast %164 : vector<1x32xf32> to vector<8x32xf32>
    %167 = arith.mulf %166, %165 : vector<8x32xf32>
    %168 = arith.addf %153, %167 : vector<8x32xf32>
    %c9_69 = arith.constant 9 : index
    %c0_70 = arith.constant 0 : index
    %169 = vector.load %arg8[%c9_69, %c0_70] : memref<13x32xf32, #tpu.memory_space<vmem>>, vector<1x32xf32>
    %c21 = arith.constant 21 : index
    %c0_71 = arith.constant 0 : index
    %170 = vector.load %arg7[%c21, %c0_71] : memref<33x32xf32, #tpu.memory_space<vmem>>, vector<1x32xf32>
    %171 = vector.broadcast %170 : vector<1x32xf32> to vector<8x32xf32>
    %172 = arith.mulf %171, %158 : vector<8x32xf32>
    %173 = vector.broadcast %169 : vector<1x32xf32> to vector<8x32xf32>
    %174 = arith.addf %173, %172 : vector<8x32xf32>
    %c22 = arith.constant 22 : index
    %c0_72 = arith.constant 0 : index
    %175 = vector.load %arg7[%c22, %c0_72] : memref<33x32xf32, #tpu.memory_space<vmem>>, vector<1x32xf32>
    %176 = vector.broadcast %175 : vector<1x32xf32> to vector<8x32xf32>
    %177 = arith.mulf %176, %163 : vector<8x32xf32>
    %178 = arith.addf %174, %177 : vector<8x32xf32>
    %c23 = arith.constant 23 : index
    %c0_73 = arith.constant 0 : index
    %179 = vector.load %arg7[%c23, %c0_73] : memref<33x32xf32, #tpu.memory_space<vmem>>, vector<1x32xf32>
    %180 = vector.broadcast %179 : vector<1x32xf32> to vector<8x32xf32>
    %181 = arith.mulf %180, %168 : vector<8x32xf32>
    %182 = arith.addf %178, %181 : vector<8x32xf32>
    %c10_74 = arith.constant 10 : index
    %c0_75 = arith.constant 0 : index
    %183 = vector.load %arg8[%c10_74, %c0_75] : memref<13x32xf32, #tpu.memory_space<vmem>>, vector<1x32xf32>
    %c24 = arith.constant 24 : index
    %c0_76 = arith.constant 0 : index
    %184 = vector.load %arg7[%c24, %c0_76] : memref<33x32xf32, #tpu.memory_space<vmem>>, vector<1x32xf32>
    %185 = vector.broadcast %184 : vector<1x32xf32> to vector<8x32xf32>
    %186 = arith.mulf %185, %158 : vector<8x32xf32>
    %187 = vector.broadcast %183 : vector<1x32xf32> to vector<8x32xf32>
    %188 = arith.addf %187, %186 : vector<8x32xf32>
    %c25 = arith.constant 25 : index
    %c0_77 = arith.constant 0 : index
    %189 = vector.load %arg7[%c25, %c0_77] : memref<33x32xf32, #tpu.memory_space<vmem>>, vector<1x32xf32>
    %190 = vector.broadcast %189 : vector<1x32xf32> to vector<8x32xf32>
    %191 = arith.mulf %190, %163 : vector<8x32xf32>
    %192 = arith.addf %188, %191 : vector<8x32xf32>
    %c26 = arith.constant 26 : index
    %c0_78 = arith.constant 0 : index
    %193 = vector.load %arg7[%c26, %c0_78] : memref<33x32xf32, #tpu.memory_space<vmem>>, vector<1x32xf32>
    %194 = vector.broadcast %193 : vector<1x32xf32> to vector<8x32xf32>
    %195 = arith.mulf %194, %168 : vector<8x32xf32>
    %196 = arith.addf %192, %195 : vector<8x32xf32>
    %c11_79 = arith.constant 11 : index
    %c0_80 = arith.constant 0 : index
    %197 = vector.load %arg8[%c11_79, %c0_80] : memref<13x32xf32, #tpu.memory_space<vmem>>, vector<1x32xf32>
    %c27 = arith.constant 27 : index
    %c0_81 = arith.constant 0 : index
    %198 = vector.load %arg7[%c27, %c0_81] : memref<33x32xf32, #tpu.memory_space<vmem>>, vector<1x32xf32>
    %199 = vector.broadcast %198 : vector<1x32xf32> to vector<8x32xf32>
    %200 = arith.mulf %199, %158 : vector<8x32xf32>
    %201 = vector.broadcast %197 : vector<1x32xf32> to vector<8x32xf32>
    %202 = arith.addf %201, %200 : vector<8x32xf32>
    %c28 = arith.constant 28 : index
    %c0_82 = arith.constant 0 : index
    %203 = vector.load %arg7[%c28, %c0_82] : memref<33x32xf32, #tpu.memory_space<vmem>>, vector<1x32xf32>
    %204 = vector.broadcast %203 : vector<1x32xf32> to vector<8x32xf32>
    %205 = arith.mulf %204, %163 : vector<8x32xf32>
    %206 = arith.addf %202, %205 : vector<8x32xf32>
    %c29 = arith.constant 29 : index
    %c0_83 = arith.constant 0 : index
    %207 = vector.load %arg7[%c29, %c0_83] : memref<33x32xf32, #tpu.memory_space<vmem>>, vector<1x32xf32>
    %208 = vector.broadcast %207 : vector<1x32xf32> to vector<8x32xf32>
    %209 = arith.mulf %208, %168 : vector<8x32xf32>
    %210 = arith.addf %206, %209 : vector<8x32xf32>
    %c9_84 = arith.constant 9 : index
    %c0_85 = arith.constant 0 : index
    %211 = vector.load %arg9[%c9_84, %c0_85] : memref<12x32xf32, #tpu.memory_space<vmem>>, vector<1x32xf32>
    %212 = math.tanh %182 : vector<8x32xf32>
    %213 = vector.broadcast %211 : vector<1x32xf32> to vector<8x32xf32>
    %214 = arith.mulf %213, %212 : vector<8x32xf32>
    %215 = arith.addf %182, %214 : vector<8x32xf32>
    %c10_86 = arith.constant 10 : index
    %c0_87 = arith.constant 0 : index
    %216 = vector.load %arg9[%c10_86, %c0_87] : memref<12x32xf32, #tpu.memory_space<vmem>>, vector<1x32xf32>
    %217 = math.tanh %196 : vector<8x32xf32>
    %218 = vector.broadcast %216 : vector<1x32xf32> to vector<8x32xf32>
    %219 = arith.mulf %218, %217 : vector<8x32xf32>
    %220 = arith.addf %196, %219 : vector<8x32xf32>
    %c11_88 = arith.constant 11 : index
    %c0_89 = arith.constant 0 : index
    %221 = vector.load %arg9[%c11_88, %c0_89] : memref<12x32xf32, #tpu.memory_space<vmem>>, vector<1x32xf32>
    %222 = math.tanh %210 : vector<8x32xf32>
    %223 = vector.broadcast %221 : vector<1x32xf32> to vector<8x32xf32>
    %224 = arith.mulf %223, %222 : vector<8x32xf32>
    %225 = arith.addf %210, %224 : vector<8x32xf32>
    %c12_90 = arith.constant 12 : index
    %c0_91 = arith.constant 0 : index
    %226 = vector.load %arg8[%c12_90, %c0_91] : memref<13x32xf32, #tpu.memory_space<vmem>>, vector<1x32xf32>
    %c30 = arith.constant 30 : index
    %c0_92 = arith.constant 0 : index
    %227 = vector.load %arg7[%c30, %c0_92] : memref<33x32xf32, #tpu.memory_space<vmem>>, vector<1x32xf32>
    %228 = vector.broadcast %227 : vector<1x32xf32> to vector<8x32xf32>
    %229 = arith.mulf %228, %215 : vector<8x32xf32>
    %230 = vector.broadcast %226 : vector<1x32xf32> to vector<8x32xf32>
    %231 = arith.addf %230, %229 : vector<8x32xf32>
    %c31 = arith.constant 31 : index
    %c0_93 = arith.constant 0 : index
    %232 = vector.load %arg7[%c31, %c0_93] : memref<33x32xf32, #tpu.memory_space<vmem>>, vector<1x32xf32>
    %233 = vector.broadcast %232 : vector<1x32xf32> to vector<8x32xf32>
    %234 = arith.mulf %233, %220 : vector<8x32xf32>
    %235 = arith.addf %231, %234 : vector<8x32xf32>
    %c32 = arith.constant 32 : index
    %c0_94 = arith.constant 0 : index
    %236 = vector.load %arg7[%c32, %c0_94] : memref<33x32xf32, #tpu.memory_space<vmem>>, vector<1x32xf32>
    %237 = vector.broadcast %236 : vector<1x32xf32> to vector<8x32xf32>
    %238 = arith.mulf %237, %225 : vector<8x32xf32>
    %239 = arith.addf %235, %238 : vector<8x32xf32>
    %240 = vector.extract_strided_slice %239 {offsets = [0, 0], sizes = [8, 16], strides = [1, 1]} : vector<8x32xf32> to vector<8x16xf32>
    %241 = vector.extract_strided_slice %239 {offsets = [0, 16], sizes = [8, 16], strides = [1, 1]} : vector<8x32xf32> to vector<8x16xf32>
    %242 = arith.addf %240, %241 : vector<8x16xf32>
    %cst_95 = arith.constant 0.000000e+00 : f32
    %243 = vector.broadcast %cst_95 : f32 to vector<8x16xf32>
    %244 = arith.cmpf ogt, %242, %243 : vector<8x16xf32>
    %cst_96 = arith.constant 0.000000e+00 : f32
    %245 = vector.broadcast %cst_96 : f32 to vector<8x16xf32>
    %246 = arith.cmpf olt, %242, %245 : vector<8x16xf32>
    %cst_97 = arith.constant -1.000000e+00 : f32
    %cst_98 = arith.constant 0.000000e+00 : f32
    %247 = vector.broadcast %cst_97 : f32 to vector<8x16xf32>
    %248 = vector.broadcast %cst_98 : f32 to vector<8x16xf32>
    %249 = arith.select %246, %247, %248 : vector<8x16xi1>, vector<8x16xf32>
    %cst_99 = arith.constant 1.000000e+00 : f32
    %250 = vector.broadcast %cst_99 : f32 to vector<8x16xf32>
    %251 = arith.select %244, %250, %249 : vector<8x16xi1>, vector<8x16xf32>
    %cst_100 = arith.constant 0.000000e+00 : f32
    %252 = vector.broadcast %cst_100 : f32 to vector<8x16xf32>
    %253 = arith.subf %252, %251 : vector<8x16xf32>
    %254 = tpu.concatenate %253, %253 in 1 : vector<8x16xf32>, vector<8x16xf32> -> vector<8x32xf32>
    %255 = arith.mulf %254, %239 : vector<8x32xf32>
    %cst_101 = arith.constant 5.000000e-01 : f32
    %256 = vector.broadcast %cst_101 : f32 to vector<8x32xf32>
    %257 = arith.mulf %256, %255 : vector<8x32xf32>
    %258 = math.tanh %257 : vector<8x32xf32>
    %cst_102 = arith.constant 1.000000e+00 : f32
    %259 = vector.broadcast %cst_102 : f32 to vector<8x32xf32>
    %260 = arith.addf %259, %258 : vector<8x32xf32>
    %cst_103 = arith.constant 5.000000e-01 : f32
    %261 = vector.broadcast %cst_103 : f32 to vector<8x32xf32>
    %262 = arith.mulf %261, %260 : vector<8x32xf32>
    %263 = vector.extract_strided_slice %262 {offsets = [0, 16], sizes = [8, 16], strides = [1, 1]} : vector<8x32xf32> to vector<8x16xf32>
    %264 = vector.extract_strided_slice %262 {offsets = [0, 0], sizes = [8, 16], strides = [1, 1]} : vector<8x32xf32> to vector<8x16xf32>
    %265 = arith.subf %263, %264 : vector<8x16xf32>
    %266 = math.absf %265 : vector<8x16xf32>
    %cst_104 = arith.constant 9.99999971E-10 : f32
    %267 = vector.broadcast %cst_104 : f32 to vector<8x16xf32>
    %268 = arith.maximumf %266, %267 : vector<8x16xf32>
    %c0_105 = arith.constant 0 : index
    %c0_106 = arith.constant 0 : index
    %269 = vector.load %arg3[%c0_105, %c0_106] : memref<16x32xf32, #tpu.memory_space<vmem>>, vector<16x32xf32>
    %cst_107 = arith.constant dense<0.000000e+00> : vector<8x32xf32>
    %270 = tpu.matmul %16, %269, %cst_107 {dimension_numbers = #tpu.dot_dimension_numbers<[1], [0], [0], [1], [0, 0, 1, 1], [], []>} : vector<8x16xf32>, vector<16x32xf32>, vector<8x32xf32> -> vector<8x32xf32>
    %c0_108 = arith.constant 0 : index
    %c0_109 = arith.constant 0 : index
    %271 = vector.load %arg4[%c0_108, %c0_109] : memref<1x32xf32, #tpu.memory_space<vmem>>, vector<1x32xf32>
    %272 = vector.broadcast %271 : vector<1x32xf32> to vector<8x32xf32>
    %273 = arith.addf %270, %272 : vector<8x32xf32>
    %cst_110 = arith.constant 0.000000e+00 : f32
    %274 = vector.broadcast %cst_110 : f32 to vector<8x32xf32>
    %275 = arith.cmpf oge, %273, %274 : vector<8x32xf32>
    %cst_111 = arith.constant 0.00999999977 : f32
    %276 = vector.broadcast %cst_111 : f32 to vector<8x32xf32>
    %277 = arith.mulf %276, %273 : vector<8x32xf32>
    %278 = arith.select %275, %273, %277 : vector<8x32xi1>, vector<8x32xf32>
    %c0_112 = arith.constant 0 : index
    %c0_113 = arith.constant 0 : index
    %279 = vector.load %arg5[%c0_112, %c0_113] : memref<16x32xf32, #tpu.memory_space<vmem>>, vector<16x32xf32>
    %cst_114 = arith.constant dense<0.000000e+00> : vector<8x32xf32>
    %280 = tpu.matmul %16, %279, %cst_114 {dimension_numbers = #tpu.dot_dimension_numbers<[1], [0], [0], [1], [0, 0, 1, 1], [], []>} : vector<8x16xf32>, vector<16x32xf32>, vector<8x32xf32> -> vector<8x32xf32>
    %c0_115 = arith.constant 0 : index
    %c0_116 = arith.constant 0 : index
    %281 = vector.load %arg6[%c0_115, %c0_116] : memref<1x32xf32, #tpu.memory_space<vmem>>, vector<1x32xf32>
    %282 = vector.broadcast %281 : vector<1x32xf32> to vector<8x32xf32>
    %283 = arith.addf %280, %282 : vector<8x32xf32>
    %cst_117 = arith.constant 0.000000e+00 : f32
    %284 = vector.broadcast %cst_117 : f32 to vector<8x32xf32>
    %285 = arith.cmpf oge, %283, %284 : vector<8x32xf32>
    %cst_118 = arith.constant 0.00999999977 : f32
    %286 = vector.broadcast %cst_118 : f32 to vector<8x32xf32>
    %287 = arith.mulf %286, %283 : vector<8x32xf32>
    %288 = arith.select %285, %283, %287 : vector<8x32xi1>, vector<8x32xf32>
    %289 = arith.subf %0, %278 : vector<8x32xf32>
    %290 = math.roundeven %289 : vector<8x32xf32>
    %291 = arith.addf %290, %278 : vector<8x32xf32>
    %292 = arith.subf %291, %278 : vector<8x32xf32>
    %293 = math.absf %292 : vector<8x32xf32>
    %cst_119 = arith.constant 0.000000e+00 : f32
    %294 = vector.broadcast %cst_119 : f32 to vector<8x32xf32>
    %295 = arith.subf %294, %293 : vector<8x32xf32>
    %cst_120 = arith.constant 1.100000e-01 : f32
    %296 = vector.broadcast %cst_120 : f32 to vector<8x32xf32>
    %297 = arith.maximumf %288, %296 : vector<8x32xf32>
    %cst_121 = arith.constant 1.000000e+00 : f32
    %298 = vector.broadcast %cst_121 : f32 to vector<8x32xf32>
    %299 = arith.divf %298, %297 : vector<8x32xf32>
    %cst_122 = arith.constant 5.000000e-01 : f32
    %300 = vector.broadcast %cst_122 : f32 to vector<8x32xf32>
    %301 = arith.addf %295, %300 : vector<8x32xf32>
    %302 = arith.mulf %301, %299 : vector<8x32xf32>
    %cst_123 = arith.constant 5.000000e-01 : f32
    %303 = vector.broadcast %cst_123 : f32 to vector<8x32xf32>
    %304 = arith.subf %295, %303 : vector<8x32xf32>
    %305 = arith.mulf %304, %299 : vector<8x32xf32>
    %306 = tpu.concatenate %302, %305 in 1 : vector<8x32xf32>, vector<8x32xf32> -> vector<8x64xf32>
    %cst_124 = arith.constant 0.707106769 : f32
    %307 = vector.broadcast %cst_124 : f32 to vector<8x64xf32>
    %308 = arith.mulf %306, %307 : vector<8x64xf32>
    %cst_125 = arith.constant 0.000000e+00 : f32
    %309 = vector.broadcast %cst_125 : f32 to vector<8x64xf32>
    %310 = arith.cmpf ogt, %308, %309 : vector<8x64xf32>
    %cst_126 = arith.constant 0.000000e+00 : f32
    %311 = vector.broadcast %cst_126 : f32 to vector<8x64xf32>
    %312 = arith.cmpf olt, %308, %311 : vector<8x64xf32>
    %cst_127 = arith.constant -1.000000e+00 : f32
    %cst_128 = arith.constant 0.000000e+00 : f32
    %313 = vector.broadcast %cst_127 : f32 to vector<8x64xf32>
    %314 = vector.broadcast %cst_128 : f32 to vector<8x64xf32>
    %315 = arith.select %312, %313, %314 : vector<8x64xi1>, vector<8x64xf32>
    %cst_129 = arith.constant 1.000000e+00 : f32
    %316 = vector.broadcast %cst_129 : f32 to vector<8x64xf32>
    %317 = arith.select %310, %316, %315 : vector<8x64xi1>, vector<8x64xf32>
    %318 = math.absf %308 : vector<8x64xf32>
    %cst_130 = arith.constant 0.327591091 : f32
    %319 = vector.broadcast %cst_130 : f32 to vector<8x64xf32>
    %320 = arith.mulf %319, %318 : vector<8x64xf32>
    %cst_131 = arith.constant 1.000000e+00 : f32
    %321 = vector.broadcast %cst_131 : f32 to vector<8x64xf32>
    %322 = arith.addf %321, %320 : vector<8x64xf32>
    %cst_132 = arith.constant 1.000000e+00 : f32
    %323 = vector.broadcast %cst_132 : f32 to vector<8x64xf32>
    %324 = arith.divf %323, %322 : vector<8x64xf32>
    %cst_133 = arith.constant 1.06140542 : f32
    %325 = vector.broadcast %cst_133 : f32 to vector<8x64xf32>
    %326 = arith.mulf %325, %324 : vector<8x64xf32>
    %cst_134 = arith.constant -1.45315206 : f32
    %327 = vector.broadcast %cst_134 : f32 to vector<8x64xf32>
    %328 = arith.addf %326, %327 : vector<8x64xf32>
    %329 = arith.mulf %328, %324 : vector<8x64xf32>
    %cst_135 = arith.constant 1.42141378 : f32
    %330 = vector.broadcast %cst_135 : f32 to vector<8x64xf32>
    %331 = arith.addf %329, %330 : vector<8x64xf32>
    %332 = arith.mulf %331, %324 : vector<8x64xf32>
    %cst_136 = arith.constant -0.284496725 : f32
    %333 = vector.broadcast %cst_136 : f32 to vector<8x64xf32>
    %334 = arith.addf %332, %333 : vector<8x64xf32>
    %335 = arith.mulf %334, %324 : vector<8x64xf32>
    %cst_137 = arith.constant 0.254829586 : f32
    %336 = vector.broadcast %cst_137 : f32 to vector<8x64xf32>
    %337 = arith.addf %335, %336 : vector<8x64xf32>
    %338 = arith.mulf %337, %324 : vector<8x64xf32>
    %cst_138 = arith.constant 0.000000e+00 : f32
    %339 = vector.broadcast %cst_138 : f32 to vector<8x64xf32>
    %340 = arith.subf %339, %318 : vector<8x64xf32>
    %341 = arith.mulf %340, %318 : vector<8x64xf32>
    %342 = math.exp %341 : vector<8x64xf32>
    %343 = arith.mulf %338, %342 : vector<8x64xf32>
    %cst_139 = arith.constant 1.000000e+00 : f32
    %344 = vector.broadcast %cst_139 : f32 to vector<8x64xf32>
    %345 = arith.subf %344, %343 : vector<8x64xf32>
    %346 = arith.mulf %317, %345 : vector<8x64xf32>
    %cst_140 = arith.constant 1.000000e+00 : f32
    %347 = vector.broadcast %cst_140 : f32 to vector<8x64xf32>
    %348 = arith.addf %347, %346 : vector<8x64xf32>
    %cst_141 = arith.constant 5.000000e-01 : f32
    %349 = vector.broadcast %cst_141 : f32 to vector<8x64xf32>
    %350 = arith.mulf %349, %348 : vector<8x64xf32>
    %351 = vector.extract_strided_slice %350 {offsets = [0, 0], sizes = [8, 32], strides = [1, 1]} : vector<8x64xf32> to vector<8x32xf32>
    %352 = vector.extract_strided_slice %350 {offsets = [0, 32], sizes = [8, 32], strides = [1, 1]} : vector<8x64xf32> to vector<8x32xf32>
    %353 = arith.subf %351, %352 : vector<8x32xf32>
    %cst_142 = arith.constant 9.99999971E-10 : f32
    %354 = vector.broadcast %cst_142 : f32 to vector<8x32xf32>
    %355 = arith.maximumf %353, %354 : vector<8x32xf32>
    %356 = math.log %355 : vector<8x32xf32>
    %cst_143 = arith.constant 0.000000e+00 : f32
    %357 = vector.broadcast %cst_143 : f32 to vector<8x32xf32>
    %358 = arith.subf %357, %356 : vector<8x32xf32>
    %359 = vector.shape_cast %358 : vector<8x32xf32> to vector<1x8x32xf32>
    %cst_144 = arith.constant dense<0.000000e+00> : vector<1xf32>
    %360 = vector.multi_reduction <add>, %359, %cst_144 [1, 2] : vector<1x8x32xf32> to vector<1xf32>
    %361 = vector.shape_cast %360 : vector<1xf32> to vector<1x1x1xf32>
    %362 = vector.extract %361[0, 0, 0] : f32 from vector<1x1x1xf32>
    %cst_145 = arith.constant 0.00563552743 : f32
    %363 = arith.mulf %362, %cst_145 : f32
    %364 = math.log %268 : vector<8x16xf32>
    %cst_146 = arith.constant 0.000000e+00 : f32
    %365 = vector.broadcast %cst_146 : f32 to vector<8x16xf32>
    %366 = arith.subf %365, %364 : vector<8x16xf32>
    %367 = vector.shape_cast %366 : vector<8x16xf32> to vector<1x8x16xf32>
    %cst_147 = arith.constant dense<0.000000e+00> : vector<1xf32>
    %368 = vector.multi_reduction <add>, %367, %cst_147 [1, 2] : vector<1x8x16xf32> to vector<1xf32>
    %369 = vector.shape_cast %368 : vector<1xf32> to vector<1x1x1xf32>
    %370 = vector.extract %369[0, 0, 0] : f32 from vector<1x1x1xf32>
    %cst_148 = arith.constant 0.0112710549 : f32
    %371 = arith.mulf %370, %cst_148 : f32
    %372 = arith.addf %363, %371 : f32
    %c0_149 = arith.constant 0 : index
    %c0_150 = arith.constant 0 : index
    %373 = memref.load %arg11[%c0_149, %c0_150] : memref<1x1xf32, #tpu.memory_space<smem>>
    memref.store %372, %arg11[%c0_149, %c0_150] : memref<1x1xf32, #tpu.memory_space<smem>>
    return
  }
}

</mosaic_0001>

<bundles_post_ra>
// kernel: tpu_custom_call.1
= control target key start
LH: loop header
LB: loop body
LE: loop exit
PB: predicated region body
PF: predicated region fallthrough
CT: control target
= control target key end

     0   :  { %vm48_vm0 = vcmask 261120   ;;  %s992_s0 = inlined_call_operand.vmem [shape: f32[8,32], index: 0, kind: input, shape index: {}]   ;;  %s993_s1 = inlined_call_operand.vmem [shape: f32[32,16], index: 1, kind: input, shape index: {}]   ;;  %s994_s2 = inlined_call_operand.vmem [shape: f32[1,16], index: 2, kind: input, shape index: {}]   ;;  %s995_s3 = inlined_call_operand.vmem [shape: f32[16,32], index: 3, kind: input, shape index: {}]   ;;  %s996_s4 = inlined_call_operand.vmem [shape: f32[1,32], index: 4, kind: input, shape index: {}]   ;;  %s997_s5 = inlined_call_operand.vmem [shape: f32[16,32], index: 5, kind: input, shape index: {}]   ;;  %s998_s6 = inlined_call_operand.vmem [shape: f32[1,32], index: 6, kind: input, shape index: {}]   ;;  %s999_s7 = inlined_call_operand.vmem [shape: f32[33,32], index: 7, kind: input, shape index: {}]   ;;  %s1000_s8 = inlined_call_operand.vmem [shape: f32[13,32], index: 8, kind: input, shape index: {}]   ;;  %s1001_s9 = inlined_call_operand.vmem [shape: f32[12,32], index: 9, kind: input, shape index: {}]   ;;  %s1002_s10 = inlined_call_operand.vmem [shape: f32[1,16], index: 10, kind: input, shape index: {}]   ;;  %s1003_s11 = inlined_call_operand.hbm [shape: f32[1,1], index: 11, kind: output, shape index: {}]  }
   0x1   :  { %v43_v0 = vld [vmem:[%s993_s1 + $0x18] sm:$0xff]  ;;  %v42_v1 = vld [vmem:[%s993_s1 + $0x10] sm:$0xff]  ;;  %v41_v2 = vld [vmem:[%s993_s1 + $0x8] sm:$0xff] }
   0x2   :  { %64 = vmatpush.msra.mxu0 %v43_v0  ;;  %v40_v3 = vld [vmem:[%s993_s1] sm:$0xff] }
   0x3   :  { %v748_v4 = vld [vmem:[%s992_s0] sm:$0xff] }
   0x4   :  { %65 = vmatpush.msra.mxu0 %v42_v1 }
   0x6   :  { %66 = vmatpush.msra.mxu0 %v41_v2 }
   0x8   :  { %67 = vmatpush.msra.mxu0 %v40_v3 }
   0x9   :  { %524 = vmatmul.msk.f32.vlgmr.msra.gmra.mxu0 %vm48_vm0, %v748_v4 }
   0xa   :  { %16 = vsyncpa [#allocation3], 0  ;;  %v336_v5 = vld [vmem:[%s995_s3 + $0x8] sm:$0xff]  ;;  %v335_v7 = vld [vmem:[%s995_s3] sm:$0xff]  ;;  %vm88_vm3 = vcmask 130048   ;;  %s668_s30 = smov 112  }
   0xb   :  { %v368_v6 = vld [vmem:[%s997_s5 + $0x8] sm:$0xff]  ;;  %358 = vmatpush.msra.mxu1 %v336_v5  ;;  %v367_v8 = vld [vmem:[%s997_s5] sm:$0xff]  ;;  %s514_s0 = sshll.u32 %s1003_s11, 4  ;;  %s672_s16 = smov [#allocation2]   ;;  %s515_s0 = int_to_ptr.hbm [resolvable:$true] %s514_s0 }
   0xc   :  { %387 = vmatpush.msra.mxu2 %v368_v6  ;;  %v555_v9 = vld [vmem:[%s994_s2] ss:$0 sm:$0xff]  ;;  %s667_s2 = smov 16   ;;  %v559_v26 = vld [vmem:[%s999_s7 + $0x1] ss:$0 sm:$0xff] }
   0xd   :  { %359 = vmatpush.msra.mxu1 %v335_v7  ;;  %v556_v12 = vld [vmem:[%s1002_s10] ss:$0 sm:$0xff]  ;;  %v561_v27 = vld [vmem:[%s999_s7 + $0x2] ss:$0 sm:$0xff]  ;;  %v560_v30 = vld [vmem:[%s1000_s8 + $0x1] ss:$0 sm:$0xff] }
   0xe   :  { %388 = vmatpush.msra.mxu2 %v367_v8  ;;  %v557_v25 = vld [vmem:[%s999_s7] ss:$0 sm:$0xff]  ;;  %v562_v31 = vld [vmem:[%s1000_s8 + $0x2] ss:$0 sm:$0xff]  ;;  %v564_v43 = vld [vmem:[%s1001_s9 + $0x1] ss:$0 sm:$0xff] }
   0xf   :  { %v558_v29 = vld [vmem:[%s1000_s8] ss:$0 sm:$0xff]  ;;  %v565_v45 = vld [vmem:[%s1001_s9 + $0x2] ss:$0 sm:$0xff]  ;;  %v566_v50 = vld [vmem:[%s999_s7 + $0x3] ss:$0 sm:$0xff] }
  0x10   :  { %v591_v40 = vld [vmem:[%s996_s4] ss:$0 sm:$0xff]  ;;  %v570_v51 = vld [vmem:[%s999_s7 + $0x6] ss:$0 sm:$0xff]  ;;  %v574_v52 = vld [vmem:[%s999_s7 + $0x9] ss:$0 sm:$0xff] }
  0x11   :  { %v563_v41 = vld [vmem:[%s1001_s9] ss:$0 sm:$0xff]  ;;  %v567_v55 = vld [vmem:[%s1000_s8 + $0x3] ss:$0 sm:$0xff]  ;;  %v568_v58 = vld [vmem:[%s999_s7 + $0x4] ss:$0 sm:$0xff] }
  0x12   :  { %v592_v48 = vld [vmem:[%s998_s6] ss:$0 sm:$0xff]  ;;  %v571_v59 = vld [vmem:[%s1000_s8 + $0x4] ss:$0 sm:$0xff]  ;;  %v572_v60 = vld [vmem:[%s999_s7 + $0x7] ss:$0 sm:$0xff] }
  0x13   :  { %v569_v0 = vld [vmem:[%s999_s7 + $0x5] ss:$0 sm:$0xff]  ;;  %v576_v2 = vld [vmem:[%s999_s7 + $0xa] ss:$0 sm:$0xff]  ;;  %v573_v7 = vld [vmem:[%s999_s7 + $0x8] ss:$0 sm:$0xff] }
  0x14   :  { %v575_v1 = vld [vmem:[%s1000_s8 + $0x5] ss:$0 sm:$0xff] }
  0x86   :  { %v69_v10 = vpop.f32.mrf.mxu0 }
  0x87   :  { %v70_v11 = vadd.f32 %v555_v9, %v69_v10 }
  0x89   :  { %vm72_vm1 = vcmp.ge.f32.partialorder %v70_v11, 0.0  ;;  %v73_v13 = vmul.f32 0.01, %v70_v11 }
  0x8b   :  { %v74_v14 = vsel %vm72_vm1, %v70_v11, %v73_v13 }
  0x8c   :  { %v79_v15 = vsub.f32 %v74_v14, %v556_v12 }
  0x8e   :  { %v531_v16 = vcvt.f32.s32 %v79_v15  ;;  %v529_v18 = vand.u32 2147483647, %v79_v15  ;;  %v534_v19 = vand.u32 2147483648, %v79_v15 }
  0x90   :  { %v532_v17 = vcvt.s32.f32 %v531_v16  ;;  %vm530_vm2 = vcmp.lt.f32.partialorder %v529_v18, 8388608.0 }
  0x92   :  { %v533_v20 = vand.u32 2147483647, %v532_v17 }
  0x94   :  { %v535_v21 = vor.u32 %v534_v19, %v533_v20 }
  0x96   :  { %v536_v22 = vsel %vm530_vm2, %v535_v21, %v79_v15 }
  0x97   :  { %v81_v23 = vadd.f32 %v556_v12, %v536_v22  ;;  %v577_v12 = vld [vmem:[%s999_s7 + $0xb] ss:$0 sm:$0xff] }
  0x99   :  { %526 = vmatmul.msk.f32.vlgmr.msra.gmra.mxu1 %vm88_vm3, %v81_v23  ;;  %527 = vmatmul.msk.f32.vlgmr.msra.gmra.mxu2 %vm88_vm3, %v81_v23  ;;  %v83_v24 = vadd.f32 0.5, %v81_v23  ;;  %v525_v28 = vadd.f32 -0.5, %v81_v23 }
  0x9b   :  { %85 = vrot.lane.b32.xlu0 %v83_v24, %s667_s2 }
 0x10d   :  { %v86_v32 = vpop.permute.xlu0 %85 }
 0x10e   :  { %v89_v33 = vsel %vm88_vm3, %v525_v28, %v86_v32 }
 0x10f   :  { %v93_v34 = vmul.f32 %v557_v25, %v89_v33  ;;  %v99_v35 = vmul.f32 %v559_v26, %v89_v33  ;;  %v105_v36 = vmul.f32 %v561_v27, %v89_v33 }
 0x111   :  { %v95_v37 = vadd.f32 %v558_v29, %v93_v34  ;;  %v101_v38 = vadd.f32 %v560_v30, %v99_v35  ;;  %v107_v39 = vadd.f32 %v562_v31, %v105_v36  ;;  %v578_v36 = vld [vmem:[%s1001_s9 + $0x3] ss:$0 sm:$0xff] }
 0x113   :  { %617 = vtanh.f32 %v95_v37 }
 0x114   :  { %619 = vtanh.f32 %v101_v38 }
 0x115   :  { %621 = vtanh.f32 %v107_v39 }
 0x116   :  { %v361_v42 = vpop.f32.mrf.mxu1 }
 0x117   :  { %v362_v44 = vadd.f32 %v591_v40, %v361_v42  ;;  %v580_v40 = vld [vmem:[%s1001_s9 + $0x5] ss:$0 sm:$0xff] }
 0x119   :  { %v618_v46 = vpop.eup %617  ;;  %vm364_vm4 = vcmp.ge.f32.partialorder %v362_v44, 0.0  ;;  %v365_v47 = vmul.f32 0.01, %v362_v44 }
 0x11a   :  { %v620_v49 = vpop.eup %619  ;;  %v111_v53 = vmul.f32 %v618_v46, %v563_v41  ;;  %v589_v46 = vld [vmem:[%s999_s7 + $0x12] ss:$0 sm:$0xff] }
 0x11b   :  { %v622_v54 = vpop.eup %621  ;;  %v116_v56 = vmul.f32 %v620_v49, %v564_v43  ;;  %v819_v57 = vsel %vm364_vm4, %v362_v44, %v365_v47  ;;  %v581_v44 = vld [vmem:[%s999_s7 + $0xc] ss:$0 sm:$0xff]  ;;  %v582_v49 = vld [vmem:[%s1000_s8 + $0x6] ss:$0 sm:$0xff] }
 0x11c   :  { %v112_v61 = vadd.f32 %v111_v53, %v95_v37  ;;  %v121_v62 = vmul.f32 %v622_v54, %v565_v45  ;;  %v390_v63 = vpop.f32.mrf.mxu2  ;;  %v396_v5 = vsub.f32 %v748_v4, %v819_v57  ;;  %v585_v45 = vld [vmem:[%s999_s7 + $0xf] ss:$0 sm:$0xff]  ;;  %v583_v53 = vld [vmem:[%s999_s7 + $0xd] ss:$0 sm:$0xff]  ;;  %v586_v54 = vld [vmem:[%s1000_s8 + $0x7] ss:$0 sm:$0xff] }
 0x11d   :  { %v117_v3 = vadd.f32 %v116_v56, %v101_v38  ;;  %v391_v6 = vadd.f32 %v592_v48, %v390_v63  ;;  %v579_v38 = vld [vmem:[%s1001_s9 + $0x4] ss:$0 sm:$0xff]  ;;  %v588_v63 = vld [vmem:[%s999_s7 + $0x11] ss:$0 sm:$0xff] }
 0x11e   :  { %v122_v8 = vadd.f32 %v121_v62, %v107_v39  ;;  %v126_v9 = vmul.f32 %v566_v50, %v112_v61  ;;  %v140_v10 = vmul.f32 %v570_v51, %v112_v61  ;;  %v154_v11 = vmul.f32 %v574_v52, %v112_v61  ;;  %v584_v62 = vld [vmem:[%s999_s7 + $0xe] ss:$0 sm:$0xff] }
 0x11f   :  { %v131_v14 = vmul.f32 %v568_v58, %v117_v3  ;;  %v145_v16 = vmul.f32 %v572_v60, %v117_v3  ;;  %v159_v4 = vmul.f32 %v576_v2, %v117_v3  ;;  %v539_v19 = vcvt.f32.s32 %v396_v5  ;;  %v590_v58 = vld [vmem:[%s999_s7 + $0x13] ss:$0 sm:$0xff]  ;;  %v593_v60 = vld [vmem:[%s1000_s8 + $0x8] ss:$0 sm:$0xff] }
 0x120   :  { %v128_v13 = vadd.f32 %v567_v55, %v126_v9  ;;  %v142_v15 = vadd.f32 %v571_v59, %v140_v10  ;;  %v135_v17 = vmul.f32 %v569_v0, %v122_v8  ;;  %v156_v18 = vadd.f32 %v575_v1, %v154_v11  ;;  %v587_v55 = vld [vmem:[%s999_s7 + $0x10] ss:$0 sm:$0xff] }
 0x121   :  { %v149_v22 = vmul.f32 %v573_v7, %v122_v8  ;;  %vm393_vm5 = vcmp.ge.f32.partialorder %v391_v6, 0.0  ;;  %v163_v24 = vmul.f32 %v577_v12, %v122_v8  ;;  %v540_v25 = vcvt.s32.f32 %v539_v19 }
 0x122   :  { %v132_v20 = vadd.f32 %v131_v14, %v128_v13  ;;  %v146_v21 = vadd.f32 %v145_v16, %v142_v15  ;;  %v160_v23 = vadd.f32 %v159_v4, %v156_v18  ;;  %v394_v26 = vmul.f32 0.01, %v391_v6 }
 0x123   :  { %v537_v29 = vand.u32 2147483647, %v396_v5  ;;  %v541_v31 = vand.u32 2147483647, %v540_v25  ;;  %v542_v32 = vand.u32 2147483648, %v396_v5 }
 0x124   :  { %v136_v27 = vadd.f32 %v135_v17, %v132_v20  ;;  %v150_v28 = vadd.f32 %v149_v22, %v146_v21  ;;  %v164_v30 = vadd.f32 %v163_v24, %v160_v23  ;;  %v395_v33 = vsel %vm393_vm5, %v391_v6, %v394_v26 }
 0x125   :  { %v847_v34 = vmax.f32 %v395_v33, 0.11  ;;  %v543_v35 = vor.u32 %v542_v32, %v541_v31  ;;  %vm538_vm6 = vcmp.lt.f32.partialorder %v537_v29, 8388608.0  ;;  %v595_v31 = vld [vmem:[%s1001_s9 + $0x6] ss:$0 sm:$0xff] }
 0x126   :  { %623 = vtanh.f32 %v136_v27  ;;  %v596_v32 = vld [vmem:[%s1001_s9 + $0x7] ss:$0 sm:$0xff]  ;;  %v597_v33 = vld [vmem:[%s1001_s9 + $0x8] ss:$0 sm:$0xff] }
 0x127   :  { %625 = vtanh.f32 %v150_v28  ;;  %v544_v37 = vsel %vm538_vm6, %v543_v35, %v396_v5  ;;  %v594_v5 = vld [vmem:[%s999_s7 + $0x14] ss:$0 sm:$0xff]  ;;  %v412_v8 = vand.u32 2147483647, %v847_v34  ;;  %v414_v9 = vand.u32 2147483648, %v847_v34 }
 0x128   :  { %627 = vtanh.f32 %v164_v30  ;;  %v398_v39 = vadd.f32 %v544_v37, %v819_v57  ;;  %vm408_vm8 = vweird.f32 %v847_v34  ;;  %v598_v37 = vld [vmem:[%s999_s7 + $0x15] ss:$0 sm:$0xff] }
 0x129   :  { %629 = vrcp.f32 %v847_v34  ;;  %v415_v25 = vor.u32 1.1754944e-38, %v414_v9  ;;  %vm413_vm10 = vcmp.eq.f32.partialorder %v412_v8, 8.507059e+37 }
 0x12a   :  { %v399_v42 = vsub.f32 %v398_v39, %v819_v57  ;;  %v606_v39 = vld [vmem:[%s999_s7 + $0x1b] ss:$0 sm:$0xff] }
 0x12c   :  { %v624_v41 = vpop.eup %623  ;;  %v873_v51 = vand.u32 2147483647, %v399_v42  ;;  %v599_v42 = vld [vmem:[%s1000_s8 + $0x9] ss:$0 sm:$0xff] }
 0x12d   :  { %v626_v43 = vpop.eup %625  ;;  %v168_v47 = vmul.f32 %v624_v41, %v578_v36 }
 0x12e   :  { %v628_v48 = vpop.eup %627  ;;  %v173_v50 = vmul.f32 %v626_v43, %v579_v38  ;;  %v401_v6 = vsub.f32 0.0, %v873_v51  ;;  %v602_v38 = vld [vmem:[%s999_s7 + $0x18] ss:$0 sm:$0xff] }
 0x12f   :  { %v630_v52 = vpop.eup %629  ;;  %v169_v56 = vadd.f32 %v168_v47, %v136_v27  ;;  %v178_v57 = vmul.f32 %v628_v48, %v580_v40  ;;  %v604_v47 = vld [vmem:[%s999_s7 + $0x19] ss:$0 sm:$0xff] }
 0x130   :  { %v174_v59 = vadd.f32 %v173_v50, %v150_v28  ;;  %v404_v61 = vmul.f32 %v630_v52, %v847_v34  ;;  %vm409_vm7 = vweird.f32 %v630_v52  ;;  %v418_v28 = vadd.f32 0.5, %v401_v6  ;;  %v608_v50 = vld [vmem:[%s999_s7 + $0x1c] ss:$0 sm:$0xff] }
 0x131   :  { %v179_v0 = vadd.f32 %v178_v57, %v164_v30  ;;  %v183_v1 = vmul.f32 %v581_v44, %v169_v56  ;;  %v197_v2 = vmul.f32 %v585_v45, %v169_v56  ;;  %v211_v3 = vmul.f32 %v589_v46, %v169_v56  ;;  %vm410_vm9 = vmor %vm408_vm8, %vm409_vm7  ;;  %v600_v45 = vld [vmem:[%s999_s7 + $0x16] ss:$0 sm:$0xff]  ;;  %v603_v46 = vld [vmem:[%s1000_s8 + $0xa] ss:$0 sm:$0xff] }
 0x132   :  { %v405_v7 = vsub.f32 1.0, %v404_v61  ;;  %v188_v11 = vmul.f32 %v583_v53, %v174_v59  ;;  %v202_v13 = vmul.f32 %v587_v55, %v174_v59  ;;  %v216_v14 = vmul.f32 %v590_v58, %v174_v59  ;;  %v605_v56 = vld [vmem:[%s999_s7 + $0x1a] ss:$0 sm:$0xff]  ;;  %v609_v58 = vld [vmem:[%s999_s7 + $0x1d] ss:$0 sm:$0xff] }
 0x133   :  { %v185_v10 = vadd.f32 %v582_v49, %v183_v1  ;;  %v199_v12 = vadd.f32 %v586_v54, %v197_v2  ;;  %v213_v15 = vadd.f32 %v593_v60, %v211_v3  ;;  %v192_v18 = vmul.f32 %v584_v62, %v179_v0  ;;  %v607_v49 = vld [vmem:[%s1000_s8 + $0xb] ss:$0 sm:$0xff]  ;;  %v601_v54 = vld [vmem:[%s999_s7 + $0x17] ss:$0 sm:$0xff] }
 0x134   :  { %v406_v16 = vmul.f32 %v630_v52, %v405_v7  ;;  %v206_v4 = vmul.f32 %v588_v63, %v179_v0  ;;  %v220_v21 = vmul.f32 %v594_v5, %v179_v0 }
 0x135   :  { %v189_v17 = vadd.f32 %v188_v11, %v185_v10  ;;  %v203_v19 = vadd.f32 %v202_v13, %v199_v12  ;;  %v217_v20 = vadd.f32 %v216_v14, %v213_v15  ;;  %v610_v12 = vld [vmem:[%s1001_s9 + $0x9] ss:$0 sm:$0xff]  ;;  %v611_v13 = vld [vmem:[%s1001_s9 + $0xa] ss:$0 sm:$0xff]  ;;  %v612_v14 = vld [vmem:[%s1001_s9 + $0xb] ss:$0 sm:$0xff] }
 0x136   :  { %v407_v22 = vadd.f32 %v630_v52, %v406_v16 }
 0x137   :  { %v193_v23 = vadd.f32 %v192_v18, %v189_v17  ;;  %v207_v24 = vadd.f32 %v206_v4, %v203_v19  ;;  %v221_v26 = vadd.f32 %v220_v21, %v217_v20  ;;  %v613_v18 = vld [vmem:[%s999_s7 + $0x1e] ss:$0 sm:$0xff] }
 0x138   :  { %v411_v27 = vsel %vm410_vm9, %v630_v52, %v407_v22  ;;  %v614_v22 = vld [vmem:[%s1000_s8 + $0xc] ss:$0 sm:$0xff]  ;;  %s671_s8 = smov 96  }
 0x139   :  { %631 = vtanh.f32 %v193_v23  ;;  %v906_v29 = vsel %vm413_vm10, %v415_v25, %v411_v27  ;;  %v616_v27 = vld [vmem:[%s999_s7 + $0x20] ss:$0 sm:$0xff] }
 0x13a   :  { %633 = vtanh.f32 %v207_v24  ;;  %v909_v30 = vmul.f32 %v418_v28, %v906_v29 }
 0x13b   :  { %635 = vtanh.f32 %v221_v26 }
 0x13f   :  { %v632_v34 = vpop.eup %631 }
 0x140   :  { %v634_v35 = vpop.eup %633  ;;  %v225_v36 = vmul.f32 %v632_v34, %v595_v31 }
 0x141   :  { %v636_v40 = vpop.eup %635  ;;  %v230_v41 = vmul.f32 %v634_v35, %v596_v32 }
 0x142   :  { %v226_v43 = vadd.f32 %v225_v36, %v193_v23  ;;  %v235_v44 = vmul.f32 %v636_v40, %v597_v33  ;;  %v615_v23 = vld [vmem:[%s999_s7 + $0x1f] ss:$0 sm:$0xff]  ;;  %s670_s7 = smov 32  }
 0x143   :  { %v231_v48 = vadd.f32 %v230_v41, %v207_v24  ;;  %v528_v41 = vadd.f32 -0.5, %v401_v6 }
 0x144   :  { %v236_v52 = vadd.f32 %v235_v44, %v221_v26  ;;  %v240_v53 = vmul.f32 %v598_v37, %v226_v43  ;;  %v254_v55 = vmul.f32 %v602_v38, %v226_v43  ;;  %v268_v57 = vmul.f32 %v606_v39, %v226_v43 }
 0x145   :  { %v245_v60 = vmul.f32 %v600_v45, %v231_v48  ;;  %v259_v62 = vmul.f32 %v604_v47, %v231_v48  ;;  %v273_v0 = vmul.f32 %v608_v50, %v231_v48  ;;  %v669_v37 = vmov 0.0  }
 0x146   :  { %v242_v59 = vadd.f32 %v599_v42, %v240_v53  ;;  %v256_v61 = vadd.f32 %v603_v46, %v254_v55  ;;  %v270_v63 = vadd.f32 %v607_v49, %v268_v57  ;;  %v249_v2 = vmul.f32 %v601_v54, %v236_v52 }
 0x147   :  { %v263_v5 = vmul.f32 %v605_v56, %v236_v52  ;;  %v277_v8 = vmul.f32 %v609_v58, %v236_v52  ;;  %v421_v42 = vmul.f32 %v528_v41, %v906_v29 }
 0x148   :  { %v246_v1 = vadd.f32 %v245_v60, %v242_v59  ;;  %v260_v3 = vadd.f32 %v259_v62, %v256_v61  ;;  %v274_v7 = vadd.f32 %v273_v0, %v270_v63 }
 0x14a   :  { %v250_v9 = vadd.f32 %v249_v2, %v246_v1  ;;  %v264_v10 = vadd.f32 %v263_v5, %v260_v3  ;;  %v278_v11 = vadd.f32 %v277_v8, %v274_v7 }
 0x14c   :  { %637 = vtanh.f32 %v250_v9 }
 0x14d   :  { %639 = vtanh.f32 %v264_v10 }
 0x14e   :  { %641 = vtanh.f32 %v278_v11 }
 0x152   :  { %v638_v15 = vpop.eup %637 }
 0x153   :  { %v640_v16 = vpop.eup %639  ;;  %v282_v17 = vmul.f32 %v638_v15, %v610_v12 }
 0x154   :  { %v642_v4 = vpop.eup %641  ;;  %v287_v19 = vmul.f32 %v640_v16, %v611_v13 }
 0x155   :  { %v283_v20 = vadd.f32 %v282_v17, %v250_v9  ;;  %v292_v21 = vmul.f32 %v642_v4, %v612_v14 }
 0x156   :  { %v288_v24 = vadd.f32 %v287_v19, %v264_v10 }
 0x157   :  { %v293_v25 = vadd.f32 %v292_v21, %v278_v11  ;;  %v297_v26 = vmul.f32 %v613_v18, %v283_v20 }
 0x158   :  { %v302_v31 = vmul.f32 %v615_v23, %v288_v24 }
 0x159   :  { %v299_v28 = vadd.f32 %v614_v22, %v297_v26  ;;  %v306_v33 = vmul.f32 %v616_v27, %v293_v25 }
 0x15b   :  { %v303_v32 = vadd.f32 %v302_v31, %v299_v28 }
 0x15d   :  { %v307_v34 = vadd.f32 %v306_v33, %v303_v32 }
 0x15f   :  { %309 = vrot.lane.b32.xlu0 %v307_v34, %s668_s30 }
 0x1d1   :  { %v310_v35 = vpop.permute.xlu0 %309 }
 0x1d2   :  { %v312_v36 = vadd.f32 %v310_v35, %v307_v34 }
 0x1d4   :  { %vm313_vm11 = vcmp.gt.f32.partialorder %v312_v36, 0.0  ;;  %vm314_vm12 = vcmp.lt.f32.partialorder %v312_v36, 0.0 }
 0x1d5   :  { %v315_v38 = vsel %vm314_vm12, -1.0, %v669_v37 }
 0x1d6   :  { %v316_v39 = vsel %vm313_vm11, 1.0, %v315_v38 }
 0x1d7   :  { %v317_v40 = vsub.f32 0.0, %v316_v39 }
 0x1d9   :  { %319 = vrot.lane.b32.xlu1 %v317_v40, %s667_s2 }
 0x1e1   :  { %423 = vrot.lane.b32.xlu1 %v421_v42, %s670_s7 }
 0x24b   :  { %v320_v43 = vpop.permute.xlu1 %319 }
 0x24c   :  { %v322_v44 = vsel %vm88_vm3, %v317_v40, %v320_v43 }
 0x24d   :  { %v323_v45 = vmul.f32 %v322_v44, %v307_v34 }
 0x24f   :  { %v324_v46 = vmul.f32 0.5, %v323_v45 }
 0x251   :  { %643 = vtanh.f32 %v324_v46 }
 0x253   :  { %v424_v47 = vpop.permute.xlu1 %423 }
 0x254   :  { %v426_v48 = vsel %vm48_vm0, %v909_v30, %v424_v47 }
 0x255   :  { %v427_v49 = vmul.f32 0.70710677, %v426_v48 }
 0x257   :  { %v644_v50 = vpop.eup %643  ;;  %v432_v52 = vand.u32 2147483647, %v427_v49  ;;  %vm429_vm2 = vcmp.lt.f32.partialorder %v427_v49, 0.0  ;;  %vm428_vm4 = vcmp.gt.f32.partialorder %v427_v49, 0.0 }
 0x258   :  { %v326_v53 = vadd.f32 1.0, %v644_v50  ;;  %v430_v14 = vsel %vm429_vm2, -1.0, %v669_v37 }
 0x259   :  { %v433_v51 = vmul.f32 0.3275911, %v432_v52  ;;  %v459_v62 = vsub.f32 0.0, %v432_v52  ;;  %v431_v17 = vsel %vm428_vm4, 1.0, %v430_v14 }
 0x25a   :  { %v327_v6 = vmul.f32 0.5, %v326_v53 }
 0x25b   :  { %v434_v54 = vadd.f32 1.0, %v433_v51  ;;  %v460_v2 = vmul.f32 %v459_v62, %v432_v52 }
 0x25c   :  { %329 = vrot.lane.b32.xlu2 %v327_v6, %s667_s2 }
 0x25d   :  { %645 = vrcp.f32 %v434_v54  ;;  %v446_v57 = vand.u32 2147483648, %v434_v54  ;;  %v444_v59 = vand.u32 2147483647, %v434_v54  ;;  %vm440_vm14 = vweird.f32 %v434_v54 }
 0x25e   :  { %v461_v7 = vmul.f32 1.442695, %v460_v2 }
 0x25f   :  { %v447_v30 = vor.u32 1.1754944e-38, %v446_v57  ;;  %vm445_vm1 = vcmp.eq.f32.partialorder %v444_v59, 8.507059e+37 }
 0x260   :  { %647 = vpow2.f32 %v461_v7 }
 0x263   :  { %v646_v29 = vpop.eup %645 }
 0x264   :  { %v436_v55 = vmul.f32 %v646_v29, %v434_v54  ;;  %vm441_vm13 = vweird.f32 %v646_v29 }
 0x265   :  { %vm442_vm15 = vmor %vm440_vm14, %vm441_vm13 }
 0x266   :  { %v437_v56 = vsub.f32 1.0, %v436_v55  ;;  %v648_v13 = vpop.eup %647 }
 0x268   :  { %v438_v58 = vmul.f32 %v646_v29, %v437_v56 }
 0x26a   :  { %v439_v60 = vadd.f32 %v646_v29, %v438_v58 }
 0x26c   :  { %v443_v61 = vsel %vm442_vm15, %v646_v29, %v439_v60 }
 0x26d   :  { %v448_v63 = vsel %vm445_vm1, %v447_v30, %v443_v61 }
 0x26e   :  { %v450_v0 = vmul.f32 1.0614054, %v448_v63 }
 0x270   :  { %v451_v1 = vadd.f32 -1.4531521, %v450_v0 }
 0x272   :  { %v452_v3 = vmul.f32 %v451_v1, %v448_v63 }
 0x274   :  { %v453_v5 = vadd.f32 1.4214138, %v452_v3 }
 0x276   :  { %v454_v8 = vmul.f32 %v453_v5, %v448_v63 }
 0x278   :  { %v455_v9 = vadd.f32 -0.28449672, %v454_v8 }
 0x27a   :  { %v456_v10 = vmul.f32 %v455_v9, %v448_v63 }
 0x27c   :  { %v457_v11 = vadd.f32 0.2548296, %v456_v10 }
 0x27e   :  { %v458_v12 = vmul.f32 %v457_v11, %v448_v63 }
 0x280   :  { %v463_v15 = vmul.f32 %v648_v13, %v458_v12 }
 0x282   :  { %v464_v16 = vsub.f32 1.0, %v463_v15 }
 0x284   :  { %v465_v18 = vmul.f32 %v464_v16, %v431_v17 }
 0x286   :  { %v466_v4 = vadd.f32 1.0, %v465_v18 }
 0x288   :  { %v467_v19 = vmul.f32 0.5, %v466_v4 }
 0x28a   :  { %469 = vrot.lane.b32.xlu2 %v467_v19, %s671_s8 }
 0x2b6   :  { %v330_v20 = vpop.permute.xlu2 %329 }
 0x2b7   :  { %v332_v21 = vsub.f32 %v327_v6, %v330_v20 }
 0x2b9   :  { %v333_v22 = vand.u32 2147483647, %v332_v21 }
 0x2bb   :  { %v334_v23 = vmax.f32 %v333_v22, 1e-09 }
 0x2bd   :  { %649 = vlog2.f32 %v334_v23 }
 0x2c3   :  { %v650_v24 = vpop.eup %649 }
 0x2c4   :  { %v489_v25 = vmul.f32 0.6931472, %v650_v24 }
 0x2c6   :  { %v490_v26 = vsub.f32 0.0, %v489_v25 }
 0x2c8   :  { %492 = vrot.lane.b32.xlu0 %v490_v26, %s668_s30 }
 0x2e4   :  { %v470_v27 = vpop.permute.xlu2 %469 }
 0x2e5   :  { %v472_v28 = vsub.f32 %v467_v19, %v470_v27 }
 0x2e7   :  { %v473_v31 = vmax.f32 %v472_v28, 1e-09 }
 0x2e9   :  { %651 = vlog2.f32 %v473_v31 }
 0x2ef   :  { %v652_v32 = vpop.eup %651 }
 0x2f0   :  { %v475_v33 = vmul.f32 0.6931472, %v652_v32 }
 0x2f2   :  { %v476_v34 = vsub.f32 0.0, %v475_v33 }
 0x2f4   :  { %v477_v35 = vsel %vm48_vm0, %v476_v34, 0.0 }
 0x2f5   :  { %478 = vadd.xlane.f32.xlu1 %v477_v35 }
 0x33a   :  { %v493_v36 = vpop.permute.xlu0 %492 }
 0x33b   :  { %v495_v37 = vsel %vm88_vm3, %v493_v36, 0.0 }
 0x33c   :  { %496 = vadd.xlane.f32.xlu2 %v495_v37 }
 0x368   :  { %v479_v38 = vpop.xlane.xlu1 %478 }
 0x369   :  { %v480_v39 = vrot.slane %v479_v38, 4 }
 0x36b   :  { %v481_v40 = vadd.f32 %v480_v39, %v479_v38 }
 0x36d   :  { %v482_v41 = vrot.slane %v481_v40, 2 }
 0x36f   :  { %v483_v42 = vadd.f32 %v482_v41, %v481_v40 }
 0x371   :  { %v484_v43 = vrot.slane %v483_v42, 1 }
 0x373   :  { %v485_v44 = vadd.f32 %v484_v43, %v483_v42 }
 0x375   :  { %545 = vpush %v485_v44 }
 0x3a6   :  { %s546_s2 = spop %545 }
 0x3a7   :  { %s487_s13 = smul.f32 0.0056355274, %s546_s2 }
 0x3af   :  { %v497_v45 = vpop.xlane.xlu2 %496 }
 0x3b0   :  { %v498_v46 = vrot.slane %v497_v45, 4 }
 0x3b2   :  { %v499_v47 = vadd.f32 %v498_v46, %v497_v45 }
 0x3b4   :  { %v500_v48 = vrot.slane %v499_v47, 2 }
 0x3b6   :  { %v501_v49 = vadd.f32 %v500_v48, %v499_v47 }
 0x3b8   :  { %v502_v50 = vrot.slane %v501_v49, 1 }
 0x3ba   :  { %v503_v52 = vadd.f32 %v502_v50, %v501_v49 }
 0x3bc   :  { %547 = vpush %v503_v52 }
 0x3ed   :  { %s548_s4 = spop %547 }
 0x3ee   :  { %s505_s14 = smul.f32 0.011271055, %s548_s4 }
 0x3f0   :  { %s506_s15 = sadd.f32 %s505_s14, %s487_s13 }
 0x3f2   :  { %508 = sst [smem:[#allocation2]] %s506_s15 }
 0x3f3   :  { %517 = dma.smem_to_hbm %s672_s16, 16, %s515_s0, [#allocation3]  }
 0x3f4   :  { %665 = dma.done.wait [#allocation3], 16  }
 0x3f5   :  { %666 = vsyncadd [#allocation3], 4294967280 }
 0x3f6   :  { %522 = sfence }
 0x3f7   :  { %523 = vsyncpa [#allocation3], 1 }

</bundles_post_ra>
